<compile_context>
chip_gen: v5e
topology: v5e:2x2
jax: 0.10.0
libtpu: 0.0.40
codegen_flags: <defaults>
</compile_context>

<pallas_src>
import functools

import jax
import jax.numpy as jnp
from jax import lax
from jax.experimental import pallas as pl
from jax.experimental.pallas import tpu as pltpu


def _round_up(x, m):
    return -(-x // m) * m


def _ensemble_dwn_kernel(x_ref, tcol_ref, trow_ref, o_ref, *,
                         slice_spans, margin, b_real, b_pad, out_lanes):
    """Single invocation, all ensemble slices fused.

    x_ref    : (b_pad, d_pad)   f32 — all slices packed at disjoint lane offsets.
    tcol_ref : (E*b_pad, 1)     i32 — labels tiled once per slice block (stacked rows).
    trow_ref : (1, b_pad)       i32 — labels along lanes.
    o_ref    : (1, out_lanes)   f32 — lane e holds the loss of ensemble slice e.
    """
    E = len(slice_spans)
    eb = E * b_pad
    f32 = jnp.float32

    x = x_ref[...]                       # (b_pad, d_pad)
    t_col = tcol_ref[...]                # (eb, 1) i32
    t_row = trow_ref[...]                # (1, b_pad) i32
    d_pad = x.shape[-1]

    # ---- constant index machinery (no vector integer div/mod) ------------
    lane_idx = lax.broadcasted_iota(jnp.int32, (1, d_pad), 1)
    c_idx = lax.broadcasted_iota(jnp.int32, (1, b_pad), 1)
    r_idx = lax.broadcasted_iota(jnp.int32, (eb, 1), 0)
    out_lane = lax.broadcasted_iota(jnp.int32, (1, out_lanes), 1)

    # Stacked-row block id via E-1 threshold compares.
    r_blk = jnp.zeros((eb, 1), jnp.int32)
    for e in range(1, E):
        r_blk = r_blk + (r_idx >= e * b_pad).astype(jnp.int32)
    i_within = r_idx - r_blk * b_pad                                 # (eb, 1)

    # ---- row-stacked, lane-masked features --------------------------------
    parts = []
    for off, width in slice_spans:
        lmask = jnp.logical_and(lane_idx >= off,
                                lane_idx < off + width).astype(f32)
        parts.append(x * lmask)                                      # (b_pad, d_pad)
    xs = jnp.concatenate(parts, axis=0)                              # (eb, d_pad)

    # Row L2 normalisation: rsqrt (EUP) + multiply, eps-guarded.
    rowss = jnp.sum(xs * xs, axis=-1, keepdims=True)                 # (eb, 1)
    xn = xs * lax.rsqrt(jnp.maximum(rowss, f32(1e-12)))              # (eb, d_pad)

    # Lane-combined per-slice-normalised RHS: slices live on disjoint lanes,
    # so summing the stacked blocks reassembles one (b_pad, d_pad) operand.
    y = xn[0:b_pad, :]
    for e in range(1, E):
        y = y + xn[e * b_pad:(e + 1) * b_pad, :]

    # ONE MXU call: row r = e*b_pad+i holds slice e's sims of anchor i.
    sim = lax.dot_general(
        xn, y,
        dimension_numbers=(((1,), (1,)), ((), ())),
        preferred_element_type=f32,
    )                                                                 # (eb, b_pad)

    # ---- label masks, rebuilt in-kernel (slice-invariant, computed once) --
    same = t_col == t_row                                             # (eb, b_pad)
    not_self = i_within != c_idx
    in_range = jnp.logical_and(i_within < b_real, c_idx < b_real)
    posf = jnp.logical_and(jnp.logical_and(same, not_self),
                           in_range).astype(f32)
    negf = jnp.logical_and(jnp.logical_not(same), in_range).astype(f32)

    big = f32(1e9)
    marginf = f32(margin)

    # ---- stacked per-anchor reductions (lane axis) -------------------------
    pos_cnt = jnp.sum(posf, axis=-1, keepdims=True)                  # (eb, 1)
    inv_pos = pl.reciprocal(jnp.maximum(pos_cnt, 1.0), approx=False)
    has_pos = pos_cnt > 0.0
    pos_loss = (pos_cnt - jnp.sum(posf * sim, axis=-1, keepdims=True)) * inv_pos

    # Hardest (smallest-similarity) positive per anchor.
    min_pos = jnp.min(sim + (1.0 - posf) * big, axis=-1, keepdims=True)

    # Negatives violating the neighbour margin: sim > min_pos - margin.
    violf = negf * (sim > (min_pos - marginf)).astype(f32)
    neg_cnt = jnp.sum(violf, axis=-1, keepdims=True)
    neg_loss = jnp.sum(violf * sim, axis=-1, keepdims=True) * pl.reciprocal(
        jnp.maximum(neg_cnt, 1.0), approx=False)

    anchor = jnp.where(jnp.logical_and(has_pos, neg_cnt > 0.0),
                       pos_loss + neg_loss, 0.0)                      # (eb, 1)

    # ---- per-slice totals: one segment-masked sublane reduce + one store ---
    seg = (r_blk == out_lane).astype(f32)                             # (eb, out_lanes)
    out_row = jnp.sum(anchor * seg, axis=0, keepdims=True)            # (1, out_lanes)
    o_ref[...] = out_row * f32(1.0 / b_real)


def dw_neighbour_losses(x_packed, slice_spans, targets, *, margin, b_real):
    """x_packed: (b_pad, d_pad) f32, targets: (b_real,) int -> (E,) losses."""
    b_pad, _ = x_packed.shape
    E = len(slice_spans)
    out_lanes = max(128, _round_up(E, 128))

    t = targets.astype(jnp.int32)
    t_pad = jnp.pad(t, (0, b_pad - b_real))          # padded labels are masked in-kernel
    t_row = t_pad.reshape(1, b_pad)
    t_col = jnp.tile(t_pad, E).reshape(E * b_pad, 1)

    kernel = functools.partial(
        _ensemble_dwn_kernel,
        slice_spans=tuple(slice_spans),
        margin=float(margin),
        b_real=int(b_real),
        b_pad=int(b_pad),
        out_lanes=out_lanes,
    )

    out = pl.pallas_call(
        kernel,
        out_shape=jax.ShapeDtypeStruct((1, out_lanes), jnp.float32),
        in_specs=[
            pl.BlockSpec(memory_space=pltpu.MemorySpace.VMEM),
            pl.BlockSpec(memory_space=pltpu.MemorySpace.VMEM),
            pl.BlockSpec(memory_space=pltpu.MemorySpace.VMEM),
        ],
        out_specs=pl.BlockSpec(memory_space=pltpu.MemorySpace.VMEM),
    )(x_packed, t_col, t_row)
    return out[0, :E]


def random_slice_indices(key, nums):
    """JAX analogue of random_slice(): shuffle range(sum(nums)) and window it."""
    dim = int(sum(nums))
    perm = jax.random.permutation(key, dim)
    return [perm[nums[i]:nums[i] + nums[i + 1]] for i in range(len(nums) - 1)]


def ensemble_dw_neighbour_loss(key, inputs, targets, *, margin=1,
                               nums=(0, 10, 11, 11)):
    """inputs: (B, D) f32, targets: (B,) int -> (loss, per-slice losses, packed feats, spans)."""
    B, D = inputs.shape
    nums = list(nums)
    assert D == sum(nums), "feature dim must equal sum(nums)"
    index_list = random_slice_indices(key, nums)

    widths = [int(idx.shape[0]) for idx in index_list]
    offsets = [0]
    for w in widths[:-1]:
        offsets.append(offsets[-1] + w)
    spans = tuple(zip(offsets, widths))
    total_d = sum(widths)

    # ONE gather packs every slice's features side-by-side (lane-disjoint;
    # overlapping index windows are simply duplicated into their own span).
    idx_all = jnp.concatenate(index_list)
    x_packed = jnp.take(inputs, idx_all, axis=1).astype(jnp.float32)

    # Pad batch rows to a sublane multiple and lanes to a full 128-lane tile.
    b_pad = _round_up(B, 8)
    d_pad = max(128, _round_up(total_d, 128))
    x_packed = jnp.pad(x_packed, ((0, b_pad - B), (0, d_pad - total_d)))

    losses = dw_neighbour_losses(x_packed, spans, targets,
                                 margin=margin, b_real=B)
    return jnp.mean(losses), losses, x_packed[:B, :total_d], spans


def _reference_losses(slice_feats, targets, margin):
    """Pure-JAX reference of the in-kernel math, for a sanity check."""
    B = slice_feats[0].shape[0]
    t = targets.astype(jnp.int32)
    same = t[:, None] == t[None, :]
    not_self = ~jnp.eye(B, dtype=bool)
    pos_mask = same & not_self
    neg_mask = ~same
    outs = []
    for x in slice_feats:
        xn = x / jnp.linalg.norm(x, axis=-1, keepdims=True)
        sim = xn @ xn.T
        pos_cnt = jnp.sum(pos_mask, axis=-1, keepdims=True).astype(jnp.float32)
        pos_loss = jnp.sum(jnp.where(pos_mask, 1.0 - sim, 0.0), axis=-1,
                           keepdims=True) / jnp.maximum(pos_cnt, 1.0)
        min_pos = jnp.min(jnp.where(pos_mask, sim, 1e9), axis=-1, keepdims=True)
        viol = neg_mask & (sim > min_pos - margin)
        neg_cnt = jnp.sum(viol, axis=-1, keepdims=True).astype(jnp.float32)
        neg_loss = jnp.sum(jnp.where(viol, sim, 0.0), axis=-1,
                           keepdims=True) / jnp.maximum(neg_cnt, 1.0)
        valid = (pos_cnt > 0) & (neg_cnt > 0)
        outs.append(jnp.sum(jnp.where(valid, pos_loss + neg_loss, 0.0)) / B)
    return jnp.stack(outs)


if __name__ == "__main__":
    key = jax.random.PRNGKey(0)
    k_data, k_slice = jax.random.split(key)

    # Small shapes consistent with the module: batch=8, feature dim = sum(nums)=32.
    B = 8
    nums = (0, 10, 11, 11)
    D = sum(nums)
    inputs = jax.random.normal(k_data, (B, D), dtype=jnp.float32)
    # 4 identity classes, 2 samples each -> every anchor has positives.
    targets = jnp.array([0, 0, 1, 1, 2, 2, 3, 3], dtype=jnp.int32)

    loss, losses, x_packed, spans = ensemble_dw_neighbour_loss(
        k_slice, inputs, targets, margin=1, nums=nums)
    loss = jax.block_until_ready(loss)

    slice_feats = [x_packed[:, off:off + w] for off, w in spans]
    ref = _reference_losses(slice_feats, targets, 1.0)
    assert jnp.allclose(losses, ref, rtol=1e-5, atol=1e-5), (losses, ref)
    assert jnp.isfinite(loss)

    print("KERNEL_OK")
</pallas_src>

<mosaic_0001>
module attributes {stable_mosaic.version = 11 : i64} {
  func.func @_ensemble_dwn_kernel(%arg0: memref<8x128xf32, #tpu.memory_space<vmem>>, %arg1: memref<24x1xi32, #tpu.memory_space<vmem>>, %arg2: memref<1x8xi32, #tpu.memory_space<vmem>>, %arg3: memref<1x128xf32, #tpu.memory_space<vmem>>) attributes {dimension_semantics = [], scalar_prefetch = 0 : i64, scratch_operands = 0 : i64, tpu.core_type = #tpu.core_type<tc>} {
    %c0 = arith.constant 0 : index
    %c0_0 = arith.constant 0 : index
    %0 = vector.load %arg0[%c0, %c0_0] : memref<8x128xf32, #tpu.memory_space<vmem>>, vector<8x128xf32>
    %c0_1 = arith.constant 0 : index
    %c0_2 = arith.constant 0 : index
    %1 = vector.load %arg1[%c0_1, %c0_2] : memref<24x1xi32, #tpu.memory_space<vmem>>, vector<24x1xi32>
    %c0_3 = arith.constant 0 : index
    %c0_4 = arith.constant 0 : index
    %2 = vector.load %arg2[%c0_3, %c0_4] : memref<1x8xi32, #tpu.memory_space<vmem>>, vector<1x8xi32>
    %3 = tpu.iota {dimensions = array<i32: 1>} : vector<1x128xi32>
    %4 = tpu.iota {dimensions = array<i32: 1>} : vector<1x8xi32>
    %5 = tpu.iota {dimensions = array<i32: 0>} : vector<24x1xi32>
    %6 = tpu.iota {dimensions = array<i32: 1>} : vector<1x128xi32>
    %c0_i32 = arith.constant 0 : i32
    %7 = vector.broadcast %c0_i32 : i32 to vector<24x1xi32>
    %c8_i32 = arith.constant 8 : i32
    %8 = vector.broadcast %c8_i32 : i32 to vector<24x1xi32>
    %9 = arith.cmpi sge, %5, %8 : vector<24x1xi32>
    %10 = arith.extui %9 : vector<24x1xi1> to vector<24x1xi32>
    %11 = arith.addi %7, %10 : vector<24x1xi32>
    %c16_i32 = arith.constant 16 : i32
    %12 = vector.broadcast %c16_i32 : i32 to vector<24x1xi32>
    %13 = arith.cmpi sge, %5, %12 : vector<24x1xi32>
    %14 = arith.extui %13 : vector<24x1xi1> to vector<24x1xi32>
    %15 = arith.addi %11, %14 : vector<24x1xi32>
    %c8_i32_5 = arith.constant 8 : i32
    %16 = vector.broadcast %c8_i32_5 : i32 to vector<24x1xi32>
    %17 = arith.muli %15, %16 : vector<24x1xi32>
    %18 = arith.subi %5, %17 : vector<24x1xi32>
    %c0_i32_6 = arith.constant 0 : i32
    %19 = vector.broadcast %c0_i32_6 : i32 to vector<1x128xi32>
    %20 = arith.cmpi sge, %3, %19 : vector<1x128xi32>
    %c10_i32 = arith.constant 10 : i32
    %21 = vector.broadcast %c10_i32 : i32 to vector<1x128xi32>
    %22 = arith.cmpi slt, %3, %21 : vector<1x128xi32>
    %23 = arith.andi %20, %22 : vector<1x128xi1>
    %24 = arith.extui %23 : vector<1x128xi1> to vector<1x128xi32>
    %25 = arith.sitofp %24 : vector<1x128xi32> to vector<1x128xf32>
    %26 = vector.broadcast %25 : vector<1x128xf32> to vector<8x128xf32>
    %27 = arith.mulf %0, %26 : vector<8x128xf32>
    %c10_i32_7 = arith.constant 10 : i32
    %28 = vector.broadcast %c10_i32_7 : i32 to vector<1x128xi32>
    %29 = arith.cmpi sge, %3, %28 : vector<1x128xi32>
    %c21_i32 = arith.constant 21 : i32
    %30 = vector.broadcast %c21_i32 : i32 to vector<1x128xi32>
    %31 = arith.cmpi slt, %3, %30 : vector<1x128xi32>
    %32 = arith.andi %29, %31 : vector<1x128xi1>
    %33 = arith.extui %32 : vector<1x128xi1> to vector<1x128xi32>
    %34 = arith.sitofp %33 : vector<1x128xi32> to vector<1x128xf32>
    %35 = vector.broadcast %34 : vector<1x128xf32> to vector<8x128xf32>
    %36 = arith.mulf %0, %35 : vector<8x128xf32>
    %c21_i32_8 = arith.constant 21 : i32
    %37 = vector.broadcast %c21_i32_8 : i32 to vector<1x128xi32>
    %38 = arith.cmpi sge, %3, %37 : vector<1x128xi32>
    %c32_i32 = arith.constant 32 : i32
    %39 = vector.broadcast %c32_i32 : i32 to vector<1x128xi32>
    %40 = arith.cmpi slt, %3, %39 : vector<1x128xi32>
    %41 = arith.andi %38, %40 : vector<1x128xi1>
    %42 = arith.extui %41 : vector<1x128xi1> to vector<1x128xi32>
    %43 = arith.sitofp %42 : vector<1x128xi32> to vector<1x128xf32>
    %44 = vector.broadcast %43 : vector<1x128xf32> to vector<8x128xf32>
    %45 = arith.mulf %0, %44 : vector<8x128xf32>
    %46 = tpu.concatenate %27, %36, %45 in 0 : vector<8x128xf32>, vector<8x128xf32>, vector<8x128xf32> -> vector<24x128xf32>
    %47 = arith.mulf %46, %46 : vector<24x128xf32>
    %cst = arith.constant dense<0.000000e+00> : vector<24xf32>
    %48 = vector.multi_reduction <add>, %47, %cst [1] : vector<24x128xf32> to vector<24xf32>
    %49 = vector.shape_cast %48 : vector<24xf32> to vector<24x1xf32>
    %cst_9 = arith.constant 9.99999996E-13 : f32
    %50 = vector.broadcast %cst_9 : f32 to vector<24x1xf32>
    %51 = arith.maximumf %49, %50 : vector<24x1xf32>
    %52 = math.rsqrt %51 : vector<24x1xf32>
    %53 = vector.broadcast %52 : vector<24x1xf32> to vector<24x128xf32>
    %54 = arith.mulf %46, %53 : vector<24x128xf32>
    %55 = vector.extract_strided_slice %54 {offsets = [0, 0], sizes = [8, 128], strides = [1, 1]} : vector<24x128xf32> to vector<8x128xf32>
    %56 = vector.extract_strided_slice %54 {offsets = [8, 0], sizes = [8, 128], strides = [1, 1]} : vector<24x128xf32> to vector<8x128xf32>
    %57 = arith.addf %55, %56 : vector<8x128xf32>
    %58 = vector.extract_strided_slice %54 {offsets = [16, 0], sizes = [8, 128], strides = [1, 1]} : vector<24x128xf32> to vector<8x128xf32>
    %59 = arith.addf %57, %58 : vector<8x128xf32>
    %cst_10 = arith.constant dense<0.000000e+00> : vector<24x8xf32>
    %60 = tpu.matmul %54, %59, %cst_10 {dimension_numbers = #tpu.dot_dimension_numbers<[1], [1], [0], [0], [0, 0, 1, 0], [], []>} : vector<24x128xf32>, vector<8x128xf32>, vector<24x8xf32> -> vector<24x8xf32>
    %61 = vector.broadcast %1 : vector<24x1xi32> to vector<24x8xi32>
    %62 = vector.broadcast %2 : vector<1x8xi32> to vector<24x8xi32>
    %63 = arith.cmpi eq, %61, %62 : vector<24x8xi32>
    %64 = vector.broadcast %18 : vector<24x1xi32> to vector<24x8xi32>
    %65 = vector.broadcast %4 : vector<1x8xi32> to vector<24x8xi32>
    %66 = arith.cmpi ne, %64, %65 : vector<24x8xi32>
    %c8_i32_11 = arith.constant 8 : i32
    %67 = vector.broadcast %c8_i32_11 : i32 to vector<24x1xi32>
    %68 = arith.cmpi slt, %18, %67 : vector<24x1xi32>
    %c8_i32_12 = arith.constant 8 : i32
    %69 = vector.broadcast %c8_i32_12 : i32 to vector<1x8xi32>
    %70 = arith.cmpi slt, %4, %69 : vector<1x8xi32>
    %71 = vector.broadcast %68 : vector<24x1xi1> to vector<24x8xi1>
    %72 = vector.broadcast %70 : vector<1x8xi1> to vector<24x8xi1>
    %73 = arith.andi %71, %72 : vector<24x8xi1>
    %74 = arith.andi %63, %66 : vector<24x8xi1>
    %75 = arith.andi %74, %73 : vector<24x8xi1>
    %76 = arith.extui %75 : vector<24x8xi1> to vector<24x8xi32>
    %77 = arith.sitofp %76 : vector<24x8xi32> to vector<24x8xf32>
    %cst_13 = arith.constant dense<true> : vector<24x8xi1>
    %78 = arith.xori %63, %cst_13 : vector<24x8xi1>
    %79 = arith.andi %78, %73 : vector<24x8xi1>
    %80 = arith.extui %79 : vector<24x8xi1> to vector<24x8xi32>
    %81 = arith.sitofp %80 : vector<24x8xi32> to vector<24x8xf32>
    %cst_14 = arith.constant dense<0.000000e+00> : vector<24xf32>
    %82 = vector.multi_reduction <add>, %77, %cst_14 [1] : vector<24x8xf32> to vector<24xf32>
    %83 = vector.shape_cast %82 : vector<24xf32> to vector<24x1xf32>
    %cst_15 = arith.constant 1.000000e+00 : f32
    %84 = vector.broadcast %cst_15 : f32 to vector<24x1xf32>
    %85 = arith.maximumf %83, %84 : vector<24x1xf32>
    %86 = tpu.reciprocal %85 : vector<24x1xf32> -> vector<24x1xf32>
    %cst_16 = arith.constant 0.000000e+00 : f32
    %87 = vector.broadcast %cst_16 : f32 to vector<24x1xf32>
    %88 = arith.cmpf ogt, %83, %87 : vector<24x1xf32>
    %89 = arith.mulf %77, %60 : vector<24x8xf32>
    %cst_17 = arith.constant dense<0.000000e+00> : vector<24xf32>
    %90 = vector.multi_reduction <add>, %89, %cst_17 [1] : vector<24x8xf32> to vector<24xf32>
    %91 = vector.shape_cast %90 : vector<24xf32> to vector<24x1xf32>
    %92 = arith.subf %83, %91 : vector<24x1xf32>
    %93 = arith.mulf %92, %86 : vector<24x1xf32>
    %cst_18 = arith.constant 1.000000e+00 : f32
    %94 = vector.broadcast %cst_18 : f32 to vector<24x8xf32>
    %95 = arith.subf %94, %77 : vector<24x8xf32>
    %cst_19 = arith.constant 1.000000e+09 : f32
    %96 = vector.broadcast %cst_19 : f32 to vector<24x8xf32>
    %97 = arith.mulf %95, %96 : vector<24x8xf32>
    %98 = arith.addf %60, %97 : vector<24x8xf32>
    %cst_20 = arith.constant dense<0x7F800000> : vector<24xf32>
    %99 = vector.multi_reduction <minimumf>, %98, %cst_20 [1] : vector<24x8xf32> to vector<24xf32>
    %100 = vector.shape_cast %99 : vector<24xf32> to vector<24x1xf32>
    %cst_21 = arith.constant 1.000000e+00 : f32
    %101 = vector.broadcast %cst_21 : f32 to vector<24x1xf32>
    %102 = arith.subf %100, %101 : vector<24x1xf32>
    %103 = vector.broadcast %102 : vector<24x1xf32> to vector<24x8xf32>
    %104 = arith.cmpf ogt, %60, %103 : vector<24x8xf32>
    %105 = arith.extui %104 : vector<24x8xi1> to vector<24x8xi32>
    %106 = arith.sitofp %105 : vector<24x8xi32> to vector<24x8xf32>
    %107 = arith.mulf %81, %106 : vector<24x8xf32>
    %cst_22 = arith.constant dense<0.000000e+00> : vector<24xf32>
    %108 = vector.multi_reduction <add>, %107, %cst_22 [1] : vector<24x8xf32> to vector<24xf32>
    %109 = vector.shape_cast %108 : vector<24xf32> to vector<24x1xf32>
    %110 = arith.mulf %107, %60 : vector<24x8xf32>
    %cst_23 = arith.constant dense<0.000000e+00> : vector<24xf32>
    %111 = vector.multi_reduction <add>, %110, %cst_23 [1] : vector<24x8xf32> to vector<24xf32>
    %112 = vector.shape_cast %111 : vector<24xf32> to vector<24x1xf32>
    %cst_24 = arith.constant 1.000000e+00 : f32
    %113 = vector.broadcast %cst_24 : f32 to vector<24x1xf32>
    %114 = arith.maximumf %109, %113 : vector<24x1xf32>
    %115 = tpu.reciprocal %114 : vector<24x1xf32> -> vector<24x1xf32>
    %116 = arith.mulf %112, %115 : vector<24x1xf32>
    %cst_25 = arith.constant 0.000000e+00 : f32
    %117 = vector.broadcast %cst_25 : f32 to vector<24x1xf32>
    %118 = arith.cmpf ogt, %109, %117 : vector<24x1xf32>
    %119 = arith.andi %88, %118 : vector<24x1xi1>
    %120 = arith.addf %93, %116 : vector<24x1xf32>
    %cst_26 = arith.constant 0.000000e+00 : f32
    %121 = vector.broadcast %cst_26 : f32 to vector<24x1xf32>
    %122 = arith.select %119, %120, %121 : vector<24x1xi1>, vector<24x1xf32>
    %123 = vector.broadcast %15 : vector<24x1xi32> to vector<24x128xi32>
    %124 = vector.broadcast %6 : vector<1x128xi32> to vector<24x128xi32>
    %125 = arith.cmpi eq, %123, %124 : vector<24x128xi32>
    %126 = arith.extui %125 : vector<24x128xi1> to vector<24x128xi32>
    %127 = arith.sitofp %126 : vector<24x128xi32> to vector<24x128xf32>
    %128 = vector.broadcast %122 : vector<24x1xf32> to vector<24x128xf32>
    %129 = arith.mulf %128, %127 : vector<24x128xf32>
    %cst_27 = arith.constant dense<0.000000e+00> : vector<128xf32>
    %130 = vector.multi_reduction <add>, %129, %cst_27 [0] : vector<24x128xf32> to vector<128xf32>
    %131 = vector.shape_cast %130 : vector<128xf32> to vector<1x128xf32>
    %cst_28 = arith.constant 1.250000e-01 : f32
    %132 = vector.broadcast %cst_28 : f32 to vector<1x128xf32>
    %133 = arith.mulf %131, %132 : vector<1x128xf32>
    %c0_29 = arith.constant 0 : index
    %c0_30 = arith.constant 0 : index
    %134 = vector.load %arg3[%c0_29, %c0_30] : memref<1x128xf32, #tpu.memory_space<vmem>>, vector<1x128xf32>
    tpu.vector_store %arg3[%c0_29, %c0_30], %133 {strides = array<i32>} : memref<1x128xf32, #tpu.memory_space<vmem>>, vector<1x128xf32>,
    return
  }
}

</mosaic_0001>

<bundles_post_ra>
// kernel: tpu_custom_call.1
= control target key start
LH: loop header
LB: loop body
LE: loop exit
PB: predicated region body
PF: predicated region fallthrough
CT: control target
= control target key end

     0   :  { %v20_v0 = vlaneseq  ;;  %s769_s0 = inlined_call_operand.vmem [shape: f32[8,128], index: 0, kind: input, shape index: {}]   ;;  %s770_s1 = inlined_call_operand.vmem [shape: s32[24,1], index: 1, kind: input, shape index: {}]   ;;  %s771_s2 = inlined_call_operand.vmem [shape: s32[1,8], index: 2, kind: input, shape index: {}]   ;;  %s772_s3 = inlined_call_operand.hbm [shape: f32[1,128], index: 3, kind: output, shape index: {}]  }
   0x1   :  { %8 = vsyncpa [#allocation3], 0  ;;  %v15_v2 = vld [vmem:[%s769_s0] sm:$0xff]  ;;  %v498_v3 = vmov 0.0   ;;  %v17_v18 = vld [vmem:[%s770_s1 + $0x8] sm:$0xff]  ;;  %v499_v20 = vmov 0  }
   0x2   :  { %v523_v1 = vand.u32 127, %v20_v0  ;;  %v16_v17 = vld [vmem:[%s770_s1] sm:$0xff]  ;;  %450 = vset.pattern.permute.xlu1 %v499_v20  ;;  %451 = vset.pattern.permute.xlu2 %v499_v20  ;;  %v18_v29 = vld [vmem:[%s770_s1 + $0x10] sm:$0xff]  ;;  %v23_v49 = vshrl.u32 %v20_v0, 7  ;;  %s412_s23 = sshll.u32 %s772_s3, 4  ;;  %s413_s23 = int_to_ptr.hbm [resolvable:$true] %s412_s23 }
   0x3   :  { %142 = vperm.xlu2 %451, %v17_v18   ;;  %452 = vset.pattern.permute.xlu0 %v499_v20  ;;  %v453_v52 = vld [vmem:[%s771_s2] ss:$0 sm:$0xff]  ;;  %s501_s2 = smov [#allocation2]  }
   0x4   :  { %vm48_vm0 = vcmp.lt.s32.totalorder %v523_v1, 10  ;;  %vm59_vm1 = vcmp.ge.s32.totalorder %v523_v1, 21  ;;  %vm60_vm2 = vcmp.lt.s32.totalorder %v523_v1, 32  ;;  %vm53_vm3 = vcmp.ge.s32.totalorder %v523_v1, 10  ;;  %s410_s20 = sshll.u32 %s501_s2, 4  ;;  %s411_s20 = int_to_ptr.vmem [resolvable:$true] %s410_s20 }
   0x5   :  { %v423_v4 = vsel %vm48_vm0, 1.0, %v498_v3  ;;  %vm61_vm4 = vmand %vm59_vm1, %vm60_vm2  ;;  %vm54_vm5 = vcmp.lt.s32.totalorder %v523_v1, 21  ;;  %v24_v50 = vadd.s32 8, %v23_v49  ;;  %v25_v53 = vadd.s32 16, %v23_v49 }
   0x6   :  { %v52_v5 = vmul.f32 %v423_v4, %v15_v2  ;;  %v425_v6 = vsel %vm61_vm4, 1.0, %v498_v3  ;;  %vm55_vm6 = vmand %vm53_vm3, %vm54_vm5  ;;  %vm157_vm1 = vcmp.lt.s32.totalorder %v523_v1, 8  ;;  %vm193_vm4 = vcmask 64512  }
   0x7   :  { %v64_v7 = vmul.f32 %v425_v6, %v15_v2  ;;  %v424_v8 = vsel %vm55_vm6, 1.0, %v498_v3  ;;  %v421_v51 = vadd.s32 4294967288, %v24_v50  ;;  %v422_v55 = vadd.s32 4294967280, %v25_v53 }
   0x8   :  { %v65_v9 = vmul.f32 %v52_v5, %v52_v5  ;;  %v58_v11 = vmul.f32 %v424_v8, %v15_v2  ;;  %vm500_vm6 = vmmov 1  }
   0x9   :  { %v67_v10 = vmul.f32 %v64_v7, %v64_v7  ;;  %vm152_vm0 = vcmp.ne.s32.totalorder %v421_v51, %v523_v1 }
   0xa   :  { %68 = vadd.xlane.f32.xlu0 %v65_v9  ;;  %v66_v12 = vmul.f32 %v58_v11, %v58_v11 }
   0xb   :  { %72 = vadd.xlane.f32.xlu1 %v67_v10  ;;  %145 = vperm.xlu2 %451, %v18_v29  }
  0x12   :  { %70 = vadd.xlane.f32.xlu0 %v66_v12 }
  0x24   :  { %139 = vperm.xlu1 %450, %v16_v17  }
  0x5d   :  { %v143_v54 = vpop.permute.xlu2 %142 }
  0x5e   :  { %vm149_vm2 = vcmp.eq.s32.totalorder %v143_v54, %v453_v52 }
  0x5f   :  { %vm170_vm3 = vmand %vm149_vm2, %vm152_vm0 }
  0x60   :  { %vm173_vm5 = vmand %vm170_vm3, %vm157_vm1  ;;  %vm151_vm3 = vcmp.ne.s32.totalorder %v23_v49, %v523_v1 }
  0x61   :  { %v555_v56 = vsel %vm173_vm5, 1.0, %v498_v3 }
  0x62   :  { %v197_v58 = vsel %vm193_vm4, %v555_v56, 0.0  ;;  %v270_v0 = vsub.f32 1.0, %v555_v56 }
  0x63   :  { %198 = vadd.xlane.f32.xlu1 %v197_v58 }
  0x65   :  { %v146_v59 = vpop.permute.xlu2 %145 }
  0x7d   :  { %v69_v13 = vpop.xlane.xlu0 %68 }
  0x7e   :  { %v74_v14 = vmax.f32 %v69_v13, 1e-12  ;;  %v73_v15 = vpop.xlane.xlu1 %72 }
  0x7f   :  { %v76_v16 = vmax.f32 %v73_v15, 1e-12 }
  0x80   :  { %454 = vrsqrt.f32 %v74_v14  ;;  %vm83_vm10 = vweird.f32 %v74_v14 }
  0x81   :  { %456 = vrsqrt.f32 %v76_v16  ;;  %vm103_vm8 = vweird.f32 %v76_v16 }
  0x85   :  { %v71_v19 = vpop.xlane.xlu0 %70 }
  0x86   :  { %v455_v21 = vpop.eup %454  ;;  %v75_v22 = vmax.f32 %v71_v19, 1e-12 }
  0x87   :  { %v457_v23 = vpop.eup %456  ;;  %v78_v24 = vmul.f32 %v455_v21, %v74_v14  ;;  %vm84_vm7 = vweird.f32 %v455_v21 }
  0x88   :  { %v98_v25 = vmul.f32 %v457_v23, %v76_v16  ;;  %458 = vrsqrt.f32 %v75_v22  ;;  %vm104_vm9 = vweird.f32 %v457_v23  ;;  %vm85_vm12 = vmor %vm83_vm10, %vm84_vm7  ;;  %vm93_vm14 = vweird.f32 %v75_v22 }
  0x89   :  { %v79_v26 = vmul.f32 %v455_v21, %v78_v24  ;;  %vm105_vm13 = vmor %vm103_vm8, %vm104_vm9  ;;  %vm153_vm9 = vcmp.ne.s32.totalorder %v422_v55, %v523_v1  ;;  %vm150_vm10 = vcmp.eq.s32.totalorder %v146_v59, %v453_v52 }
  0x8a   :  { %v99_v27 = vmul.f32 %v457_v23, %v98_v25  ;;  %vm182_vm7 = vmxor %vm149_vm2, %vm500_vm6 }
  0x8b   :  { %v80_v28 = vmul.f32 0.5, %v79_v26  ;;  %vm559_vm8 = vmand %vm182_vm7, %vm157_vm1 }
  0x8c   :  { %v100_v30 = vmul.f32 0.5, %v99_v27  ;;  %v430_v24 = vsel %vm559_vm8, 1.0, %v498_v3 }
  0x8d   :  { %v81_v32 = vsub.f32 1.5, %v80_v28 }
  0x8e   :  { %v459_v31 = vpop.eup %458  ;;  %v101_v34 = vsub.f32 1.5, %v100_v30 }
  0x8f   :  { %v88_v33 = vmul.f32 %v459_v31, %v75_v22  ;;  %v82_v36 = vmul.f32 %v455_v21, %v81_v32  ;;  %vm94_vm11 = vweird.f32 %v459_v31 }
  0x90   :  { %v102_v38 = vmul.f32 %v457_v23, %v101_v34  ;;  %vm95_vm15 = vmor %vm93_vm14, %vm94_vm11 }
  0x91   :  { %v89_v35 = vmul.f32 %v459_v31, %v88_v33  ;;  %v86_v40 = vsel %vm85_vm12, %v455_v21, %v82_v36  ;;  %vm171_vm11 = vmand %vm150_vm10, %vm153_vm9 }
  0x92   :  { %v106_v43 = vsel %vm105_vm13, %v457_v23, %v102_v38  ;;  %v107_v44 = vmul.f32 %v86_v40, %v52_v5  ;;  %vm174_vm12 = vmand %vm171_vm11, %vm157_vm1  ;;  %v273_v5 = vmul.f32 1e+09, %v270_v0 }
  0x93   :  { %v90_v37 = vmul.f32 0.5, %v89_v35  ;;  %v109_v46 = vmul.f32 %v106_v43, %v64_v7  ;;  %vm183_vm13 = vmxor %vm150_vm10, %vm500_vm6  ;;  %v428_v4 = vsel %vm174_vm12, 1.0, %v498_v3 }
  0x94   :  { %vm571_vm14 = vmand %vm183_vm13, %vm157_vm1  ;;  %v271_v9 = vsub.f32 1.0, %v428_v4  ;;  %v200_v19 = vsel %vm193_vm4, %v428_v4, 0.0 }
  0x95   :  { %v91_v39 = vsub.f32 1.5, %v90_v37  ;;  %v431_v35 = vsel %vm571_vm14, 1.0, %v498_v3 }
  0x96   :  { %v140_v61 = vpop.permute.xlu1 %139  ;;  %v274_v14 = vmul.f32 1e+09, %v271_v9 }
  0x97   :  { %v92_v41 = vmul.f32 %v459_v31, %v91_v39 }
  0x99   :  { %v96_v42 = vsel %vm95_vm15, %v459_v31, %v92_v41  ;;  %vm148_vm15 = vcmp.eq.s32.totalorder %v140_v61, %v453_v52 }
  0x9a   :  { %v108_v45 = vmul.f32 %v96_v42, %v58_v11  ;;  %vm181_vm0 = vmxor %vm148_vm15, %vm500_vm6 }
  0x9b   :  { %vm578_vm2 = vmand %vm181_vm0, %vm157_vm1 }
  0x9c   :  { %v110_v47 = vadd.f32 %v108_v45, %v107_v44  ;;  %vm169_vm5 = vmand %vm148_vm15, %vm151_vm3  ;;  %v429_v26 = vsel %vm578_vm2, 1.0, %v498_v3 }
  0x9d   :  { %vm172_vm7 = vmand %vm169_vm5, %vm157_vm1 }
  0x9e   :  { %v111_v48 = vadd.f32 %v110_v47, %v109_v46  ;;  %v426_v63 = vsel %vm172_vm7, 1.0, %v498_v3 }
  0x9f   :  { %v269_v2 = vsub.f32 1.0, %v426_v63  ;;  %v194_v18 = vsel %vm193_vm4, %v426_v63, 0.0 }
  0xa0   :  { %127 = vmatpush.xpose.msra.mxu0 %v111_v48  ;;  %444 = vmatpush.xpose.msra.mxu1 %v111_v48 }
  0xa1   :  { %445 = vmatpush.xpose.msra.mxu2 %v111_v48  ;;  %v272_v6 = vmul.f32 1e+09, %v269_v2 }
  0xa3   :  { %128 = vmatmul.f32.vlgmr.msra.gmra.mxu0 %v107_v44  ;;  %131 = vmatmul.f32.vlgmr.msra.gmra.mxu1 %v108_v45 }
  0xa4   :  { %134 = vmatmul.f32.vlgmr.msra.gmra.mxu2 %v109_v46 }
  0xd6   :  { %v617_v51 = vpop.xlane.xlu1 %198 }
  0xd7   :  { %v204_v52 = vmax.f32 %v617_v51, 1.0 }
  0xd9   :  { %460 = vrcp.f32 %v204_v52 }
 0x120   :  { %v129_v7 = vpop.f32.mrf.mxu0  ;;  %v132_v8 = vpop.f32.mrf.mxu1 }
 0x121   :  { %v276_v10 = vadd.f32 %v273_v5, %v132_v8  ;;  %v275_v11 = vadd.f32 %v272_v6, %v129_v7  ;;  %v252_v40 = vmul.f32 %v555_v56, %v132_v8  ;;  %v251_v41 = vmul.f32 %v426_v63, %v129_v7  ;;  %v461_v56 = vpop.eup %460 }
 0x122   :  { %v221_v58 = vmul.f32 %v461_v56, %v204_v52  ;;  %vm226_vm9 = vweird.f32 %v461_v56 }
 0x123   :  { %v281_v12 = vsel %vm193_vm4, %v276_v10, inf  ;;  %v278_v13 = vsel %vm193_vm4, %v275_v11, inf  ;;  %v257_v42 = vsel %vm193_vm4, %v252_v40, 0.0  ;;  %v254_v43 = vsel %vm193_vm4, %v251_v41, 0.0 }
 0x124   :  { %282 = vmin.xlane.f32.xlu2 %v281_v12  ;;  %279 = vmin.xlane.f32.xlu0 %v278_v13  ;;  %v222_v63 = vsub.f32 1.0, %v221_v58 }
 0x127   :  { %v135_v15 = vpop.f32.mrf.mxu2 }
 0x128   :  { %v277_v16 = vadd.f32 %v274_v14, %v135_v15  ;;  %v253_v45 = vmul.f32 %v428_v4, %v135_v15  ;;  %v223_v4 = vmul.f32 %v461_v56, %v222_v63  ;;  %v229_v14 = vand.u32 2147483647, %v204_v52 }
 0x12a   :  { %v284_v17 = vsel %vm193_vm4, %v277_v16, inf  ;;  %v260_v47 = vsel %vm193_vm4, %v253_v45, 0.0  ;;  %v224_v13 = vadd.f32 %v461_v56, %v223_v4  ;;  %vm671_vm12 = vcmp.eq.f32.partialorder %v229_v14, 8.507059e+37 }
 0x12c   :  { %285 = vmin.xlane.f32.xlu0 %v284_v17 }
 0x134   :  { %195 = vadd.xlane.f32.xlu0 %v194_v18 }
 0x13c   :  { %201 = vadd.xlane.f32.xlu0 %v200_v19 }
 0x197   :  { %v283_v20 = vpop.xlane.xlu2 %282  ;;  %v280_v21 = vpop.xlane.xlu0 %279 }
 0x198   :  { %v433_v22 = vadd.f32 -1.0, %v283_v20  ;;  %v432_v23 = vadd.f32 -1.0, %v280_v21 }
 0x19a   :  { %vm291_vm1 = vcmp.gt.f32.partialorder %v132_v8, %v433_v22  ;;  %vm290_vm6 = vcmp.gt.f32.partialorder %v129_v7, %v432_v23 }
 0x19b   :  { %v436_v25 = vsel %vm291_vm1, 1.0, %v498_v3  ;;  %v435_v27 = vsel %vm290_vm6, 1.0, %v498_v3 }
 0x19c   :  { %v299_v28 = vmul.f32 %v435_v27, %v429_v26  ;;  %v300_v29 = vmul.f32 %v436_v25, %v430_v24 }
 0x19e   :  { %v302_v30 = vsel %vm193_vm4, %v299_v28, 0.0  ;;  %v312_v31 = vmul.f32 %v300_v29, %v132_v8  ;;  %v305_v38 = vsel %vm193_vm4, %v300_v29, 0.0  ;;  %v311_v44 = vmul.f32 %v299_v28, %v129_v7 }
 0x19f   :  { %303 = vadd.xlane.f32.xlu0 %v302_v30  ;;  %v286_v32 = vpop.xlane.xlu0 %285 }
 0x1a0   :  { %v434_v33 = vadd.f32 -1.0, %v286_v32  ;;  %v317_v34 = vsel %vm193_vm4, %v312_v31, 0.0  ;;  %v314_v46 = vsel %vm193_vm4, %v311_v44, 0.0 }
 0x1a1   :  { %318 = vadd.xlane.f32.xlu1 %v317_v34 }
 0x1a2   :  { %vm292_vm8 = vcmp.gt.f32.partialorder %v135_v15, %v434_v33 }
 0x1a3   :  { %v437_v36 = vsel %vm292_vm8, 1.0, %v498_v3 }
 0x1a4   :  { %v301_v37 = vmul.f32 %v437_v36, %v431_v35 }
 0x1a6   :  { %v308_v39 = vsel %vm193_vm4, %v301_v37, 0.0  ;;  %v313_v48 = vmul.f32 %v301_v37, %v135_v15  ;;  %v231_v15 = vand.u32 2147483648, %v204_v52 }
 0x1a7   :  { %306 = vadd.xlane.f32.xlu0 %v305_v38  ;;  %309 = vadd.xlane.f32.xlu2 %v308_v39  ;;  %v615_v50 = vpop.xlane.xlu0 %195 }
 0x1a8   :  { %v320_v49 = vsel %vm193_vm4, %v313_v48, 0.0  ;;  %v621_v53 = vmax.f32 %v615_v50, 1.0  ;;  %vm225_vm4 = vweird.f32 %v204_v52  ;;  %v232_v23 = vor.u32 1.1754944e-38, %v231_v15 }
 0x1a9   :  { %vm661_vm10 = vmor %vm225_vm4, %vm226_vm9  ;;  %vm439_vm4 = vcmp.eq.s32.totalorder %v523_v1, 1 }
 0x1aa   :  { %462 = vrcp.f32 %v621_v53  ;;  %v228_v21 = vsel %vm661_vm10, %v461_v56, %v224_v13  ;;  %v217_v24 = vand.u32 2147483648, %v621_v53  ;;  %vm211_vm13 = vweird.f32 %v621_v53 }
 0x1ab   :  { %v215_v26 = vand.u32 2147483647, %v621_v53  ;;  %v233_v39 = vsel %vm671_vm12, %v232_v23, %v228_v21  ;;  %vm438_vm12 = vcmp.eq.s32.totalorder %v523_v1, 0  ;;  %v442_v21 = vsel %vm439_vm4, 1.0, %v498_v3 }
 0x1ac   :  { %v218_v40 = vor.u32 1.1754944e-38, %v217_v24 }
 0x1ad   :  { %vm216_vm7 = vcmp.eq.f32.partialorder %v215_v26, 8.507059e+37 }
 0x1af   :  { %258 = vadd.xlane.f32.xlu2 %v257_v42  ;;  %255 = vadd.xlane.f32.xlu0 %v254_v43  ;;  %v623_v54 = vpop.xlane.xlu0 %201 }
 0x1b0   :  { %v626_v55 = vmax.f32 %v623_v54, 1.0  ;;  %v630_v57 = vpop.eup %462  ;;  %vm250_vm4 = vcmp.gt.f32.partialorder %v623_v54, 0.0 }
 0x1b1   :  { %v207_v62 = vmul.f32 %v630_v57, %v621_v53  ;;  %vm212_vm11 = vweird.f32 %v630_v57 }
 0x1b2   :  { %464 = vrcp.f32 %v626_v55  ;;  %v245_v28 = vand.u32 2147483648, %v626_v55  ;;  %vm682_vm15 = vmor %vm211_vm13, %vm212_vm11  ;;  %vm239_vm2 = vweird.f32 %v626_v55  ;;  %v243_v43 = vand.u32 2147483647, %v626_v55 }
 0x1b3   :  { %v208_v2 = vsub.f32 1.0, %v207_v62 }
 0x1b4   :  { %v246_v44 = vor.u32 1.1754944e-38, %v245_v28 }
 0x1b5   :  { %v209_v11 = vmul.f32 %v630_v57, %v208_v2 }
 0x1b7   :  { %315 = vadd.xlane.f32.xlu2 %v314_v46  ;;  %261 = vadd.xlane.f32.xlu0 %v260_v47  ;;  %v210_v19 = vadd.f32 %v630_v57, %v209_v11 }
 0x1b8   :  { %v637_v61 = vpop.eup %464 }
 0x1b9   :  { %v235_v0 = vmul.f32 %v637_v61, %v626_v55  ;;  %vm240_vm14 = vweird.f32 %v637_v61  ;;  %v214_v34 = vsel %vm682_vm15, %v630_v57, %v210_v19 }
 0x1ba   :  { %vm705_vm5 = vmor %vm239_vm2, %vm240_vm14  ;;  %v219_v47 = vsel %vm216_vm7, %v218_v40, %v214_v34  ;;  %vm244_vm7 = vcmp.eq.f32.partialorder %v243_v43, 8.507059e+37 }
 0x1bb   :  { %v236_v10 = vsub.f32 1.0, %v235_v0 }
 0x1bd   :  { %v237_v18 = vmul.f32 %v637_v61, %v236_v10 }
 0x1bf   :  { %321 = vadd.xlane.f32.xlu0 %v320_v49  ;;  %v689_v32 = vadd.f32 %v637_v61, %v237_v18 }
 0x1c1   :  { %v242_v49 = vsel %vm705_vm5, %v637_v61, %v689_v32  ;;  %vm248_vm5 = vcmp.gt.f32.partialorder %v615_v50, 0.0 }
 0x1c2   :  { %v247_v23 = vsel %vm244_vm7, %v246_v44, %v242_v49 }
 0x212   :  { %v632_v59 = vpop.xlane.xlu0 %303 }
 0x213   :  { %v635_v60 = vmax.f32 %v632_v59, 1.0  ;;  %vm371_vm15 = vcmp.gt.f32.partialorder %v632_v59, 0.0 }
 0x214   :  { %v319_v13 = vpop.xlane.xlu1 %318 }
 0x215   :  { %466 = vrcp.f32 %v635_v60  ;;  %v335_v35 = vand.u32 2147483647, %v635_v60  ;;  %v337_v36 = vand.u32 2147483648, %v635_v60  ;;  %vm331_vm3 = vweird.f32 %v635_v60 }
 0x217   :  { %vm336_vm6 = vcmp.eq.f32.partialorder %v335_v35, 8.507059e+37  ;;  %v338_v53 = vor.u32 1.1754944e-38, %v337_v36 }
 0x21a   :  { %v644_v5 = vpop.xlane.xlu2 %309  ;;  %v646_v6 = vpop.xlane.xlu0 %306 }
 0x21b   :  { %v648_v7 = vpop.eup %466  ;;  %v651_v8 = vmax.f32 %v644_v5, 1.0  ;;  %v654_v9 = vmax.f32 %v646_v6, 1.0 }
 0x21c   :  { %v327_v12 = vmul.f32 %v648_v7, %v635_v60  ;;  %vm332_vm0 = vweird.f32 %v648_v7 }
 0x21d   :  { %468 = vrcp.f32 %v651_v8  ;;  %vm709_vm1 = vmor %vm331_vm3, %vm332_vm0  ;;  %v351_v52 = vand.u32 2147483648, %v654_v9  ;;  %v349_v57 = vand.u32 2147483647, %v654_v9  ;;  %vm345_vm9 = vweird.f32 %v654_v9 }
 0x21e   :  { %470 = vrcp.f32 %v654_v9  ;;  %v328_v17 = vsub.f32 1.0, %v327_v12  ;;  %vm359_vm13 = vweird.f32 %v651_v8  ;;  %v365_v10 = vand.u32 2147483648, %v651_v8 }
 0x21f   :  { %vm350_vm14 = vcmp.eq.f32.partialorder %v349_v57, 8.507059e+37  ;;  %v363_v12 = vand.u32 2147483647, %v651_v8  ;;  %vm372_vm0 = vcmp.gt.f32.partialorder %v646_v6, 0.0  ;;  %vm249_vm3 = vcmp.gt.f32.partialorder %v617_v51, 0.0 }
 0x220   :  { %v329_v20 = vmul.f32 %v648_v7, %v328_v17  ;;  %v366_v59 = vor.u32 1.1754944e-38, %v365_v10 }
 0x222   :  { %v259_v25 = vpop.xlane.xlu2 %258  ;;  %v256_v27 = vpop.xlane.xlu0 %255  ;;  %v330_v31 = vadd.f32 %v648_v7, %v329_v20 }
 0x223   :  { %v680_v29 = vpop.eup %468  ;;  %v263_v58 = vsub.f32 %v615_v50, %v256_v27  ;;  %v264_v60 = vsub.f32 %v617_v51, %v259_v25  ;;  %v441_v50 = vsel %vm438_vm12, 1.0, %v498_v3 }
 0x224   :  { %v471_v33 = vpop.eup %470  ;;  %v355_v37 = vmul.f32 %v680_v29, %v651_v8  ;;  %v334_v48 = vsel %vm709_vm1, %v648_v7, %v330_v31  ;;  %vm360_vm10 = vweird.f32 %v680_v29  ;;  %v352_v7 = vor.u32 1.1754944e-38, %v351_v52  ;;  %vm748_vm1 = vmand %vm248_vm5, %vm371_vm15 }
 0x225   :  { %v341_v38 = vmul.f32 %v471_v33, %v654_v9  ;;  %vm346_vm8 = vweird.f32 %v471_v33  ;;  %v339_v61 = vsel %vm336_vm6, %v338_v53, %v334_v48  ;;  %v266_v9 = vmul.f32 %v263_v58, %v219_v47  ;;  %vm738_vm2 = vmor %vm359_vm13, %vm360_vm10 }
 0x226   :  { %v356_v45 = vsub.f32 1.0, %v355_v37  ;;  %vm347_vm11 = vmor %vm345_vm9, %vm346_vm8  ;;  %v267_v14 = vmul.f32 %v264_v60, %v233_v39  ;;  %vm364_vm6 = vcmp.eq.f32.partialorder %v363_v12, 8.507059e+37  ;;  %vm373_vm8 = vcmp.gt.f32.partialorder %v644_v5, 0.0 }
 0x227   :  { %v342_v46 = vsub.f32 1.0, %v341_v38  ;;  %vm375_vm9 = vmand %vm249_vm3, %vm372_vm0  ;;  %vm440_vm10 = vcmp.eq.s32.totalorder %v523_v1, 2 }
 0x228   :  { %v357_v56 = vmul.f32 %v680_v29, %v356_v45  ;;  %v443_v5 = vsel %vm440_vm10, 1.0, %v498_v3 }
 0x229   :  { %v343_v55 = vmul.f32 %v471_v33, %v342_v46 }
 0x22a   :  { %v316_v62 = vpop.xlane.xlu2 %315  ;;  %v262_v63 = vpop.xlane.xlu0 %261  ;;  %v358_v4 = vadd.f32 %v680_v29, %v357_v56 }
 0x22b   :  { %v344_v0 = vadd.f32 %v471_v33, %v343_v55  ;;  %v368_v2 = vmul.f32 %v339_v61, %v316_v62  ;;  %v265_v19 = vsub.f32 %v623_v54, %v262_v63 }
 0x22c   :  { %v362_v8 = vsel %vm738_vm2, %v680_v29, %v358_v4 }
 0x22d   :  { %v348_v11 = vsel %vm347_vm11, %v471_v33, %v344_v0  ;;  %v377_v18 = vadd.f32 %v368_v2, %v266_v9  ;;  %v367_v51 = vsel %vm364_vm6, %v366_v59, %v362_v8  ;;  %v268_v27 = vmul.f32 %v265_v19, %v247_v23  ;;  %vm376_vm11 = vmand %vm250_vm4, %vm373_vm8 }
 0x22e   :  { %v353_v15 = vsel %vm350_vm14, %v352_v7, %v348_v11 }
 0x22f   :  { %v369_v17 = vmul.f32 %v353_v15, %v319_v13  ;;  %v380_v26 = vsel %vm748_vm1, %v377_v18, 0.0 }
 0x230   :  { %v392_v30 = vmul.f32 %v441_v50, %v380_v26 }
 0x231   :  { %v378_v22 = vadd.f32 %v369_v17, %v267_v14 }
 0x232   :  { %v322_v24 = vpop.xlane.xlu0 %321 }
 0x233   :  { %v381_v25 = vsel %vm375_vm9, %v378_v22, 0.0  ;;  %v370_v28 = vmul.f32 %v367_v51, %v322_v24 }
 0x234   :  { %v393_v29 = vmul.f32 %v442_v21, %v381_v25 }
 0x235   :  { %v379_v6 = vadd.f32 %v370_v28, %v268_v27 }
 0x236   :  { %v395_v32 = vadd.f32 %v393_v29, %v392_v30 }
 0x237   :  { %v382_v31 = vsel %vm376_vm11, %v379_v6, 0.0 }
 0x238   :  { %v394_v33 = vmul.f32 %v443_v5, %v382_v31 }
 0x23a   :  { %v396_v34 = vadd.f32 %v395_v32, %v394_v33 }
 0x23c   :  { %v397_v1 = vrot.slane %v396_v34, 4 }
 0x23e   :  { %v398_v35 = vadd.f32 %v397_v1, %v396_v34 }
 0x240   :  { %v399_v36 = vrot.slane %v398_v35, 2 }
 0x242   :  { %v400_v37 = vadd.f32 %v399_v36, %v398_v35 }
 0x244   :  { %v401_v38 = vrot.slane %v400_v37, 1 }
 0x246   :  { %v402_v54 = vadd.f32 %v401_v38, %v400_v37 }
 0x248   :  { %v403_v3 = vmul.f32 0.125, %v402_v54 }
 0x24a   :  { %404 = vst [vmem:[#allocation2] sm:$0x1] %v403_v3 }
 0x24b   :  { %415 = dma.vmem_to_hbm [thread:$0]  %s411_s20, 16, %s413_s23, [#allocation3]  }
 0x24c   :  { %496 = dma.done.wait [#allocation3], 16  }
 0x24d   :  { %497 = vsyncadd [#allocation3], 4294967280 }
 0x24e   :  { %420 = vsyncpa [#allocation3], 1 }

</bundles_post_ra>
